<compile_context>
chip_gen: v5e
topology: v5e:2x2
jax: 0.10.0
libtpu: 0.0.40
codegen_flags: <defaults>
</compile_context>

<pallas_src>
import functools

import jax
import jax.numpy as jnp
from jax.experimental import pallas as pl
from jax.experimental.pallas import tpu as pltpu


def _round_up(x, m):
    return (x + m - 1) // m * m


def _prenet_kernel(x_ref, *rest, num_layers, dropout, use_dropout):
    """rest = w_refs[0..L-1], [bits_refs[0..L-1] if use_dropout], o_ref."""
    w_refs = rest[:num_layers]
    if use_dropout:
        bits_refs = rest[num_layers:2 * num_layers]
        o_ref = rest[2 * num_layers]
        threshold = jnp.uint32(min(int(dropout * float(2 ** 32)), 2 ** 32 - 1))
        scale = 1.0 / (1.0 - dropout)
    else:
        bits_refs = (None,) * num_layers
        o_ref = rest[num_layers]

    h = x_ref[...].astype(jnp.float32)
    for w_ref, b_ref in zip(w_refs, bits_refs):
        h = jnp.dot(h, w_ref[...].astype(jnp.float32),
                    preferred_element_type=jnp.float32,
                    precision=jax.lax.Precision.HIGHEST)
        h = jnp.maximum(h, 0.0)                       # ReLU
        if b_ref is not None:                         # fused dropout
            keep = b_ref[...] >= threshold            # P(keep) = 1 - dropout
            h = jnp.where(keep, h * scale, 0.0)
    o_ref[...] = h.astype(o_ref.dtype)


def prenet_forward(x, weights, *, dropout=0.5, train=False, dropout_bits=None,
                   block_b=256):
    """Fused Pallas Prenet forward.

    x:        (B, in_dim) activations.
    weights:  list of (in_features, out_features) arrays (pre-transposed
              vs. torch nn.Linear).
    dropout_bits: if train and dropout>0, a list of uint32 arrays, one per
              layer, shaped (B, out_features_l) — the dropout randomness.
    """
    B, Din = x.shape
    dins = [Din] + [w.shape[1] for w in weights[:-1]]
    outs = [w.shape[1] for w in weights]
    num_layers = len(weights)

    # Lane-dense padding (last dims -> multiples of 128), batch -> multiple of 8.
    din_pads = [_round_up(d, 128) for d in dins]
    out_pads = [_round_up(d, 128) for d in outs]
    tb = min(_round_up(B, 8), block_b)
    B_pad = _round_up(B, tb)

    x_p = jnp.zeros((B_pad, din_pads[0]), x.dtype).at[:B, :Din].set(x)

    w_ps = []
    for w, dpi, dpo, di, do in zip(weights, din_pads, out_pads, dins, outs):
        w_ps.append(jnp.zeros((dpi, dpo), w.dtype).at[:di, :do].set(w))

    use_dropout = bool(train) and float(dropout) > 0.0
    bits_ps = []
    if use_dropout:
        assert dropout_bits is not None and len(dropout_bits) == num_layers, (
            "train-mode dropout needs one uint32 bits array per layer")
        for bits, dpo, do in zip(dropout_bits, out_pads, outs):
            bits_ps.append(
                jnp.zeros((B_pad, dpo), jnp.uint32)
                .at[:B, :do].set(bits.astype(jnp.uint32)))

    grid = (B_pad // tb,)

    in_specs = [pl.BlockSpec((tb, din_pads[0]), lambda i: (i, 0))]
    for dpi, dpo in zip(din_pads, out_pads):
        # Weights: same block every grid step -> stays resident in VMEM.
        in_specs.append(pl.BlockSpec((dpi, dpo), lambda i: (0, 0)))
    if use_dropout:
        for dpo in out_pads:
            in_specs.append(pl.BlockSpec((tb, dpo), lambda i: (i, 0)))
    out_spec = pl.BlockSpec((tb, out_pads[-1]), lambda i: (i, 0))

    kernel = functools.partial(_prenet_kernel, num_layers=num_layers,
                               dropout=float(dropout), use_dropout=use_dropout)

    flops = sum(2 * B_pad * dpi * dpo for dpi, dpo in zip(din_pads, out_pads))
    bytes_accessed = (x_p.size * x_p.dtype.itemsize
                      + sum(w.size * w.dtype.itemsize for w in w_ps)
                      + sum(b.size * 4 for b in bits_ps)
                      + B_pad * out_pads[-1] * x.dtype.itemsize)

    y_p = pl.pallas_call(
        kernel,
        out_shape=jax.ShapeDtypeStruct((B_pad, out_pads[-1]), x.dtype),
        grid=grid,
        in_specs=in_specs,
        out_specs=out_spec,
        compiler_params=pltpu.CompilerParams(
            dimension_semantics=("parallel",)),
        cost_estimate=pl.CostEstimate(flops=flops, transcendentals=0,
                                      bytes_accessed=bytes_accessed),
    )(x_p, *w_ps, *bits_ps)

    return y_p[:B, :outs[-1]]


def make_prenet_params(key, in_dim, sizes, dtype=jnp.float32):
    """Xavier-uniform init; weights returned as (in_features, out_features)."""
    in_sizes = [in_dim] + list(sizes[:-1])
    weights = []
    for in_size, out_size in zip(in_sizes, sizes):
        key, sub = jax.random.split(key)
        limit = (6.0 / (in_size + out_size)) ** 0.5
        weights.append(jax.random.uniform(sub, (in_size, out_size), dtype,
                                          minval=-limit, maxval=limit))
    return weights


def prenet_reference(x, weights, *, dropout=0.5, train=False, dropout_bits=None):
    """Plain-JAX reference (same dropout-bits convention as the kernel)."""
    for li, w in enumerate(weights):
        x = jnp.maximum(
            jnp.dot(x, w, preferred_element_type=jnp.float32,
                    precision=jax.lax.Precision.HIGHEST), 0.0)
        if train and dropout > 0.0:
            thr = jnp.uint32(min(int(dropout * float(2 ** 32)), 2 ** 32 - 1))
            keep = dropout_bits[li] >= thr
            x = jnp.where(keep, x * (1.0 / (1.0 - dropout)), 0.0)
    return x


if __name__ == "__main__":
    key = jax.random.PRNGKey(0)
    k_x, k_w, k_d = jax.random.split(key, 3)

    batch, in_dim = 8, 16
    sizes = [32, 32]

    x = jax.random.normal(k_x, (batch, in_dim), jnp.float32)
    weights = make_prenet_params(k_w, in_dim, sizes)

    # --- Eval mode: dropout is identity (nn.Dropout.eval()), deterministic. ---
    # TODO(synk): canonical Tacotron applies dropout at inference too; flip
    # train=True (with bits) if that behavior is desired.
    y = prenet_forward(x, weights, dropout=0.5, train=False)
    y = jax.block_until_ready(y)
    y_ref = prenet_reference(x, weights)
    assert y.shape == (batch, sizes[-1])
    assert jnp.allclose(y, y_ref, atol=1e-4, rtol=1e-4)

    # --- Train mode: fused dropout with explicit uint32 bits (checkable). ---
    bits = []
    kk = k_d
    for out_dim in sizes:
        kk, sub = jax.random.split(kk)
        bits.append(jax.random.bits(sub, (batch, out_dim), dtype=jnp.uint32))
    y_tr = prenet_forward(x, weights, dropout=0.5, train=True, dropout_bits=bits)
    y_tr = jax.block_until_ready(y_tr)
    y_tr_ref = prenet_reference(x, weights, dropout=0.5, train=True,
                                dropout_bits=bits)
    assert y_tr.shape == (batch, sizes[-1])
    assert jnp.allclose(y_tr, y_tr_ref, atol=1e-4, rtol=1e-4)

    print("KERNEL_OK")
</pallas_src>

<mosaic_0001>
module attributes {stable_mosaic.version = 11 : i64} {
  func.func @_prenet_kernel(%arg0: i32, %arg1: memref<8x128xf32, #tpu.memory_space<vmem>>, %arg2: memref<128x128xf32, #tpu.memory_space<vmem>>, %arg3: memref<128x128xf32, #tpu.memory_space<vmem>>, %arg4: memref<8x128xf32, #tpu.memory_space<vmem>>) attributes {dimension_semantics = [#tpu.dimension_semantics<parallel>], iteration_bounds = array<i64: 1>, scalar_prefetch = 0 : i64, scratch_operands = 0 : i64, tpu.core_type = #tpu.core_type<tc>, window_params = [{transform_indices = @transform_0, window_bounds = array<i64: 8, 128>}, {pipeline_mode = #tpu.pipeline_mode<synchronous>, transform_indices = @transform_1, window_bounds = array<i64: 128, 128>}, {pipeline_mode = #tpu.pipeline_mode<synchronous>, transform_indices = @transform_2, window_bounds = array<i64: 128, 128>}, {transform_indices = @transform_3, window_bounds = array<i64: 8, 128>}]} {
    %c0 = arith.constant 0 : index
    %c0_0 = arith.constant 0 : index
    %0 = vector.load %arg1[%c0, %c0_0] : memref<8x128xf32, #tpu.memory_space<vmem>>, vector<8x128xf32>
    %c0_1 = arith.constant 0 : index
    %c0_2 = arith.constant 0 : index
    %1 = vector.load %arg2[%c0_1, %c0_2] : memref<128x128xf32, #tpu.memory_space<vmem>>, vector<128x128xf32>
    %cst = arith.constant dense<0.000000e+00> : vector<8x128xf32>
    %2 = tpu.matmul %0, %1, %cst {dimension_numbers = #tpu.dot_dimension_numbers<[1], [0], [0], [1], [0, 0, 1, 1], [], []>, precision = #tpu.contract_precision<fp32>} : vector<8x128xf32>, vector<128x128xf32>, vector<8x128xf32> -> vector<8x128xf32>
    %cst_3 = arith.constant 0.000000e+00 : f32
    %3 = vector.broadcast %cst_3 : f32 to vector<8x128xf32>
    %4 = arith.maximumf %2, %3 : vector<8x128xf32>
    %c0_4 = arith.constant 0 : index
    %c0_5 = arith.constant 0 : index
    %5 = vector.load %arg3[%c0_4, %c0_5] : memref<128x128xf32, #tpu.memory_space<vmem>>, vector<128x128xf32>
    %cst_6 = arith.constant dense<0.000000e+00> : vector<8x128xf32>
    %6 = tpu.matmul %4, %5, %cst_6 {dimension_numbers = #tpu.dot_dimension_numbers<[1], [0], [0], [1], [0, 0, 1, 1], [], []>, precision = #tpu.contract_precision<fp32>} : vector<8x128xf32>, vector<128x128xf32>, vector<8x128xf32> -> vector<8x128xf32>
    %cst_7 = arith.constant 0.000000e+00 : f32
    %7 = vector.broadcast %cst_7 : f32 to vector<8x128xf32>
    %8 = arith.maximumf %6, %7 : vector<8x128xf32>
    %c0_8 = arith.constant 0 : index
    %c0_9 = arith.constant 0 : index
    %9 = vector.load %arg4[%c0_8, %c0_9] : memref<8x128xf32, #tpu.memory_space<vmem>>, vector<8x128xf32>
    tpu.vector_store %arg4[%c0_8, %c0_9], %8 {strides = array<i32>} : memref<8x128xf32, #tpu.memory_space<vmem>>, vector<8x128xf32>,
    return
  }
  func.func @transform_0(%arg0: i32) -> (i32, i32) {
    %c0_i32 = arith.constant 0 : i32
    %c0_i32_0 = arith.constant 0 : i32
    return %arg0, %c0_i32 : i32, i32
  }
  func.func @transform_1(%arg0: i32) -> (i32, i32) {
    %c0_i32 = arith.constant 0 : i32
    %c0_i32_0 = arith.constant 0 : i32
    %c0_i32_1 = arith.constant 0 : i32
    return %c0_i32, %c0_i32_0 : i32, i32
  }
  func.func @transform_2(%arg0: i32) -> (i32, i32) {
    %c0_i32 = arith.constant 0 : i32
    %c0_i32_0 = arith.constant 0 : i32
    %c0_i32_1 = arith.constant 0 : i32
    return %c0_i32, %c0_i32_0 : i32, i32
  }
  func.func @transform_3(%arg0: i32) -> (i32, i32) {
    %c0_i32 = arith.constant 0 : i32
    %c0_i32_0 = arith.constant 0 : i32
    return %arg0, %c0_i32 : i32, i32
  }
}

</mosaic_0001>

<bundles_post_ra>
// kernel: tpu_custom_call.1
= control target key start
LH: loop header
LB: loop body
LE: loop exit
PB: predicated region body
PF: predicated region fallthrough
CT: control target
= control target key end

     0   :  { %8 = vsyncpa [#allocation3], 0  ;;  %s1428_s0 = inlined_call_operand.hbm [shape: f32[8,128], index: 0, kind: input, shape index: {}]   ;;  %s1429_s1 = inlined_call_operand.hbm [shape: f32[128,128], index: 1, kind: input, shape index: {}]   ;;  %s1430_s2 = inlined_call_operand.hbm [shape: f32[128,128], index: 2, kind: input, shape index: {}]   ;;  %s1431_s3 = inlined_call_operand.hbm [shape: f32[8,128], index: 3, kind: output, shape index: {}]  }
   0x1   :  { %9 = vsyncpa [#allocation6], 0  ;;  %s26_s14 = sshll.u32 %s1429_s1, 4  ;;  %s27_s14 = int_to_ptr.hbm [resolvable:$true] %s26_s14 }
   0x2   :  { %10 = vsyncpa [#allocation4], 0  ;;  %s904_s15 = smov [#allocation5]   ;;  %s16_s19 = sshll.u32 %s1428_s0, 4  ;;  %s17_s19 = int_to_ptr.hbm [resolvable:$true] %s16_s19 }
   0x3   :  { %s28_s16 = sshll.u32 %s904_s15, 4  ;;  %s905_s20 = smov 128   ;;  %s29_s16 = int_to_ptr.vmem [resolvable:$true] %s28_s16 }
   0x4   :  { %s906_s21 = smov 8   ;;  %s907_s22 = smov [#allocation2]  }
   0x5   :  { %34 = dma.hbm_to_vmem [thread:$0]  %s27_s14, 2048, %s29_s16, [#allocation6], %s905_s20, %s905_s20, %s906_s21  }
   0x6   :  { %s18_s23 = sshll.u32 %s907_s22, 4  ;;  %s39_s26 = sshll.u32 %s1430_s2, 4  ;;  %s19_s23 = int_to_ptr.vmem [resolvable:$true] %s18_s23  ;;  %s40_s26 = int_to_ptr.hbm [resolvable:$true] %s39_s26 }
   0x7   :  { %21 = dma.hbm_to_vmem [thread:$0]  %s17_s19, 128, %s19_s23, [#allocation3]  }
   0x8   :  { %s908_s1 = smov [#allocation7]  }
   0x9   :  { %s41_s27 = sshll.u32 %s908_s1, 4  ;;  %s42_s27 = int_to_ptr.vmem [resolvable:$true] %s41_s27 }
   0xa   :  { %47 = dma.hbm_to_vmem [thread:$0]  %s40_s26, 2048, %s42_s27, [#allocation6], %s905_s20, %s905_s20, %s906_s21  }
   0xb   :  { %898 = dma.done.wait [#allocation3], 128  }
   0xc   :  { %899 = vsyncadd [#allocation3], 4294967168 }
   0xd   :  { %900 = dma.done.wait [#allocation6], 4096  }
   0xe   :  { %901 = vsyncadd [#allocation6], 4294963200  ;;  %v76_v0 = vld [vmem:[#allocation5 + $0x78] sm:$0xff]  ;;  %v75_v1 = vld [vmem:[#allocation5 + $0x70] sm:$0xff]  ;;  %s909_s0 = smov [#allocation8]   ;;  %s785_s30 = sshll.u32 %s1431_s3, 4  ;;  %s786_s30 = int_to_ptr.hbm [resolvable:$true] %s785_s30 }
   0xf   :  { %v74_v2 = vld [vmem:[#allocation5 + $0x68] sm:$0xff]  ;;  %v939_v3 = vand.u32 4294901760, %v76_v0  ;;  %v941_v4 = vand.u32 4294901760, %v75_v1  ;;  %v73_v6 = vld [vmem:[#allocation5 + $0x60] sm:$0xff]  ;;  %v72_v7 = vld [vmem:[#allocation5 + $0x58] sm:$0xff]  ;;  %s783_s2 = sshll.u32 %s909_s0, 4  ;;  %s784_s2 = int_to_ptr.vmem [resolvable:$true] %s783_s2 }
  0x10   :  { %v943_v5 = vand.u32 4294901760, %v74_v2  ;;  %v71_v8 = vld [vmem:[#allocation5 + $0x50] sm:$0xff]  ;;  %v945_v9 = vand.u32 4294901760, %v73_v6  ;;  %v947_v10 = vand.u32 4294901760, %v72_v7  ;;  %v70_v12 = vld [vmem:[#allocation5 + $0x48] sm:$0xff]  ;;  %v69_v13 = vld [vmem:[#allocation5 + $0x40] sm:$0xff] }
  0x11   :  { %v949_v11 = vand.u32 4294901760, %v71_v8  ;;  %78 = vmatpush.msra.mxu0 %v939_v3  ;;  %v953_v14 = vsub.f32 %v76_v0, %v939_v3  ;;  %v956_v15 = vsub.f32 %v75_v1, %v941_v4  ;;  %v961_v17 = vand.u32 4294901760, %v70_v12  ;;  %v68_v18 = vld [vmem:[#allocation5 + $0x38] sm:$0xff]  ;;  %274 = vmatpush.msra.mxu3 %v939_v3  ;;  %v67_v26 = vld [vmem:[#allocation5 + $0x30] sm:$0xff]  ;;  %v66_v36 = vld [vmem:[#allocation5 + $0x28] sm:$0xff] }
  0x12   :  { %v959_v16 = vsub.f32 %v74_v2, %v943_v5  ;;  %v965_v19 = vsub.f32 %v73_v6, %v945_v9  ;;  %v968_v20 = vsub.f32 %v72_v7, %v947_v10  ;;  %v977_v25 = vand.u32 4294901760, %v69_v13  ;;  %v65_v42 = vld [vmem:[#allocation5 + $0x20] sm:$0xff]  ;;  %v64_v47 = vld [vmem:[#allocation5 + $0x18] sm:$0xff]  ;;  %v63_v55 = vld [vmem:[#allocation5 + $0x10] sm:$0xff] }
  0x13   :  { %v971_v21 = vsub.f32 %v71_v8, %v949_v11  ;;  %80 = vmatpush.msra.mxu0 %v941_v4  ;;  %v120_v22 = vand.u32 4294901760, %v953_v14  ;;  %v126_v23 = vand.u32 4294901760, %v956_v15  ;;  %221 = vmatpush.msra.mxu2 %v953_v14  ;;  %v981_v28 = vand.u32 4294901760, %v68_v18  ;;  %v62_v60 = vld [vmem:[#allocation5 + $0x8] sm:$0xff]  ;;  %v61_v1 = vld [vmem:[#allocation5] sm:$0xff]  ;;  %v60_v7 = vld [vmem:[#allocation2] sm:$0xff] }
  0x14   :  { %v132_v24 = vand.u32 4294901760, %v959_v16  ;;  %v138_v27 = vand.u32 4294901760, %v965_v19  ;;  %v984_v29 = vsub.f32 %v70_v12, %v961_v17  ;;  %276 = vmatpush.msra.mxu3 %v941_v4  ;;  %v144_v33 = vand.u32 4294901760, %v968_v20 }
  0x15   :  { %82 = vmatpush.msra.mxu0 %v943_v5  ;;  %v121_v30 = vsub.f32 %v953_v14, %v120_v22  ;;  %v127_v31 = vsub.f32 %v956_v15, %v126_v23  ;;  %224 = vmatpush.msra.mxu2 %v956_v15  ;;  %v150_v34 = vand.u32 4294901760, %v971_v21  ;;  %v1000_v35 = vand.u32 4294901760, %v67_v26  ;;  %v434_v14 = vld [vmem:[#allocation7 + $0x78] sm:$0xff] }
  0x16   :  { %v133_v32 = vsub.f32 %v959_v16, %v132_v24  ;;  %278 = vmatpush.msra.mxu3 %v943_v5  ;;  %v139_v39 = vsub.f32 %v965_v19, %v138_v27  ;;  %v1008_v40 = vsub.f32 %v69_v13, %v977_v25  ;;  %v156_v41 = vand.u32 4294901760, %v984_v29 }
  0x17   :  { %v122_v37 = vand.u32 4294901760, %v121_v30  ;;  %84 = vmatpush.msra.mxu0 %v945_v9  ;;  %v128_v38 = vand.u32 4294901760, %v127_v31  ;;  %227 = vmatpush.msra.mxu2 %v959_v16  ;;  %v145_v44 = vsub.f32 %v968_v20, %v144_v33  ;;  %v1017_v45 = vand.u32 4294901760, %v66_v36 }
  0x18   :  { %280 = vmatpush.msra.mxu3 %v945_v9  ;;  %v134_v43 = vand.u32 4294901760, %v133_v32  ;;  %v1020_v46 = vsub.f32 %v68_v18, %v981_v28  ;;  %v151_v48 = vsub.f32 %v971_v21, %v150_v34  ;;  %v140_v49 = vand.u32 4294901760, %v139_v39 }
  0x19   :  { %123 = vmatpush.msra.mxu1 %v122_v37  ;;  %86 = vmatpush.msra.mxu0 %v947_v10  ;;  %v162_v50 = vand.u32 4294901760, %v1008_v40  ;;  %v1029_v51 = vand.u32 4294901760, %v65_v42  ;;  %v1032_v52 = vsub.f32 %v67_v26, %v1000_v35  ;;  %v157_v53 = vsub.f32 %v984_v29, %v156_v41 }
  0x1a   :  { %230 = vmatpush.msra.mxu2 %v965_v19  ;;  %282 = vmatpush.msra.mxu3 %v947_v10  ;;  %v1037_v54 = vand.u32 4294901760, %v64_v47  ;;  %v146_v56 = vand.u32 4294901760, %v145_v44  ;;  %v168_v57 = vand.u32 4294901760, %v1020_v46  ;;  %v1044_v58 = vsub.f32 %v66_v36, %v1017_v45 }
  0x1b   :  { %129 = vmatpush.msra.mxu1 %v128_v38  ;;  %88 = vmatpush.msra.mxu0 %v949_v11  ;;  %v152_v59 = vand.u32 4294901760, %v151_v48  ;;  %v163_v61 = vsub.f32 %v1008_v40, %v162_v50  ;;  %v174_v62 = vand.u32 4294901760, %v1032_v52  ;;  %v1053_v63 = vand.u32 4294901760, %v63_v55 }
  0x1c   :  { %233 = vmatpush.msra.mxu2 %v968_v20  ;;  %284 = vmatpush.msra.mxu3 %v949_v11  ;;  %v1056_v0 = vsub.f32 %v65_v42, %v1029_v51  ;;  %v158_v2 = vand.u32 4294901760, %v157_v53  ;;  %v1059_v6 = vsub.f32 %v64_v47, %v1037_v54  ;;  %v169_v8 = vsub.f32 %v1020_v46, %v168_v57  ;;  %v427_v20 = vld [vmem:[#allocation7 + $0x40] sm:$0xff] }
  0x1d   :  { %135 = vmatpush.msra.mxu1 %v134_v43  ;;  %90 = vmatpush.msra.mxu0 %v961_v17  ;;  %v180_v12 = vand.u32 4294901760, %v1044_v58  ;;  %v1068_v13 = vand.u32 4294901760, %v62_v60  ;;  %v1070_v18 = vand.u32 4294901760, %v60_v7  ;;  %v1072_v26 = vand.u32 4294901760, %v61_v1 }
  0x1e   :  { %236 = vmatpush.msra.mxu2 %v971_v21  ;;  %286 = vmatpush.msra.mxu3 %v961_v17  ;;  %v164_v30 = vand.u32 4294901760, %v163_v61  ;;  %v175_v31 = vsub.f32 %v1032_v52, %v174_v62  ;;  %v186_v32 = vand.u32 4294901760, %v1056_v0  ;;  %v1082_v36 = vsub.f32 %v63_v55, %v1053_v63 }
  0x1f   :  { %141 = vmatpush.msra.mxu1 %v140_v49  ;;  %92 = vmatpush.msra.mxu0 %v977_v25  ;;  %v192_v37 = vand.u32 4294901760, %v1059_v6  ;;  %v170_v38 = vand.u32 4294901760, %v169_v8  ;;  %v181_v39 = vsub.f32 %v1044_v58, %v180_v12  ;;  %v1092_v42 = vsub.f32 %v62_v60, %v1068_v13 }
  0x20   :  { %239 = vmatpush.msra.mxu2 %v984_v29  ;;  %288 = vmatpush.msra.mxu3 %v977_v25  ;;  %v110_v43 = vsub.f32 %v60_v7, %v1070_v18  ;;  %v176_v44 = vand.u32 4294901760, %v175_v31  ;;  %v187_v47 = vsub.f32 %v1056_v0, %v186_v32  ;;  %v198_v48 = vand.u32 4294901760, %v1082_v36 }
  0x21   :  { %147 = vmatpush.msra.mxu1 %v146_v56  ;;  %94 = vmatpush.msra.mxu0 %v981_v28  ;;  %v1103_v49 = vsub.f32 %v61_v1, %v1072_v26  ;;  %v182_v53 = vand.u32 4294901760, %v181_v39  ;;  %v193_v55 = vsub.f32 %v1059_v6, %v192_v37  ;;  %v204_v56 = vand.u32 4294901760, %v1092_v42 }
  0x22   :  { %242 = vmatpush.msra.mxu2 %v1008_v40  ;;  %290 = vmatpush.msra.mxu3 %v981_v28  ;;  %v188_v60 = vand.u32 4294901760, %v187_v47  ;;  %v199_v61 = vsub.f32 %v1082_v36, %v198_v48  ;;  %v432_v47 = vld [vmem:[#allocation7 + $0x68] sm:$0xff]  ;;  %v1145_v15 = vand.u32 4294901760, %v434_v14  ;;  %v426_v40 = vld [vmem:[#allocation7 + $0x38] sm:$0xff] }
  0x23   :  { %153 = vmatpush.msra.mxu1 %v152_v59  ;;  %96 = vmatpush.msra.mxu0 %v1000_v35  ;;  %v111_v59 = vand.u32 4294901760, %v110_v43  ;;  %v210_v1 = vand.u32 4294901760, %v1103_v49  ;;  %v205_v7 = vsub.f32 %v1092_v42, %v204_v56  ;;  %v1149_v16 = vand.u32 4294901760, %v432_v47 }
  0x24   :  { %245 = vmatpush.msra.mxu2 %v1020_v46  ;;  %292 = vmatpush.msra.mxu3 %v1000_v35  ;;  %v1224_v46 = vand.u32 4294901760, %v426_v40 }
  0x25   :  { %159 = vmatpush.msra.mxu1 %v158_v2  ;;  %98 = vmatpush.msra.mxu0 %v1017_v45  ;;  %v194_v2 = vand.u32 4294901760, %v193_v55  ;;  %v112_v8 = vsub.f32 %v110_v43, %v111_v59  ;;  %v211_v31 = vsub.f32 %v1103_v49, %v210_v1 }
  0x26   :  { %248 = vmatpush.msra.mxu2 %v1032_v52  ;;  %294 = vmatpush.msra.mxu3 %v1017_v45  ;;  %v1239_v52 = vsub.f32 %v426_v40, %v1224_v46 }
  0x27   :  { %165 = vmatpush.msra.mxu1 %v164_v30  ;;  %100 = vmatpush.msra.mxu0 %v1029_v51  ;;  %v200_v30 = vand.u32 4294901760, %v199_v61  ;;  %v113_v39 = vand.u32 4294901760, %v112_v8  ;;  %v1185_v8 = vand.u32 4294901760, %v427_v20 }
  0x28   :  { %251 = vmatpush.msra.mxu2 %v1044_v58  ;;  %296 = vmatpush.msra.mxu3 %v1029_v51 }
  0x29   :  { %171 = vmatpush.msra.mxu1 %v170_v38  ;;  %102 = vmatpush.msra.mxu0 %v1037_v54  ;;  %v206_v38 = vand.u32 4294901760, %v205_v7 }
  0x2a   :  { %254 = vmatpush.msra.mxu2 %v1056_v0  ;;  %298 = vmatpush.msra.mxu3 %v1037_v54  ;;  %v420_v0 = vld [vmem:[#allocation7 + $0x8] sm:$0xff] }
  0x2b   :  { %177 = vmatpush.msra.mxu1 %v176_v44  ;;  %104 = vmatpush.msra.mxu0 %v1053_v63  ;;  %v212_v44 = vand.u32 4294901760, %v211_v31 }
  0x2c   :  { %257 = vmatpush.msra.mxu2 %v1059_v6  ;;  %300 = vmatpush.msra.mxu3 %v1053_v63  ;;  %v419_v6 = vld [vmem:[#allocation7] sm:$0xff] }
  0x2d   :  { %183 = vmatpush.msra.mxu1 %v182_v53  ;;  %106 = vmatpush.msra.mxu0 %v1068_v13  ;;  %v429_v53 = vld [vmem:[#allocation7 + $0x50] sm:$0xff] }
  0x2e   :  { %260 = vmatpush.msra.mxu2 %v1082_v36  ;;  %302 = vmatpush.msra.mxu3 %v1068_v13  ;;  %v1156_v55 = vand.u32 4294901760, %v429_v53 }
  0x2f   :  { %189 = vmatpush.msra.mxu1 %v188_v60  ;;  %108 = vmatpush.msra.mxu0 %v1072_v26  ;;  %v1168_v60 = vsub.f32 %v432_v47, %v1149_v16 }
  0x30   :  { %263 = vmatpush.msra.mxu2 %v1092_v42  ;;  %304 = vmatpush.msra.mxu3 %v1072_v26  ;;  %v1190_v31 = vsub.f32 %v429_v53, %v1156_v55 }
  0x31   :  { %315 = vmatpush.msrb.mxu0 %v120_v22  ;;  %195 = vmatpush.msra.mxu1 %v194_v2  ;;  %v433_v22 = vld [vmem:[#allocation7 + $0x70] sm:$0xff]  ;;  %v490_v7 = vand.u32 4294901760, %v1168_v60 }
  0x32   :  { %266 = vmatpush.msra.mxu2 %v1103_v49  ;;  %308 = vmatmul.f32.vlgmr.msra.gmra.mxu3 %v111_v59 }
  0x33   :  { %319 = vmatpush.msrb.mxu0 %v126_v23  ;;  %201 = vmatpush.msra.mxu1 %v200_v30  ;;  %v1147_v23 = vand.u32 4294901760, %v433_v22 }
  0x34   :  { %269 = vmatmul.f32.vlgmr.msra.gmra.mxu2 %v110_v43  ;;  %114 = vmatmul.f32.vlgmr.msra.gmra.mxu0 %v113_v39  ;;  %v430_v43 = vld [vmem:[#allocation7 + $0x58] sm:$0xff] }
  0x35   :  { %323 = vmatpush.msrb.mxu0 %v132_v24  ;;  %207 = vmatpush.msra.mxu1 %v206_v38  ;;  %v431_v24 = vld [vmem:[#allocation7 + $0x60] sm:$0xff]  ;;  %v1165_v59 = vsub.f32 %v433_v22, %v1147_v23  ;;  %v491_v38 = vsub.f32 %v1168_v60, %v490_v7 }
  0x36   :  { %v1152_v19 = vand.u32 4294901760, %v431_v24  ;;  %436 = vmatpush.msrb.mxu2 %v1145_v15 }
  0x37   :  { %327 = vmatpush.msrb.mxu0 %v138_v27  ;;  %213 = vmatpush.msra.mxu1 %v212_v44  ;;  %v1154_v27 = vand.u32 4294901760, %v430_v43  ;;  %v1213_v44 = vsub.f32 %v427_v20, %v1185_v8  ;;  %v492_v53 = vand.u32 4294901760, %v491_v38 }
  0x38   :  { %215 = vmatmul.f32.vlgmr.msra.gmra.mxu1 %v1070_v18  ;;  %v1173_v2 = vsub.f32 %v431_v24, %v1152_v19  ;;  %438 = vmatpush.msrb.mxu2 %v1147_v23  ;;  %v508_v24 = vand.u32 4294901760, %v1190_v31 }
  0x39   :  { %382 = vmatpush.msrb.mxu1 %v939_v3  ;;  %331 = vmatpush.msrb.mxu0 %v144_v33  ;;  %v428_v3 = vld [vmem:[#allocation7 + $0x48] sm:$0xff]  ;;  %v1162_v33 = vsub.f32 %v434_v14, %v1145_v15 }
  0x3a   :  { %v1170_v61 = vand.u32 4294901760, %v428_v3  ;;  %v496_v30 = vand.u32 4294901760, %v1173_v2  ;;  %440 = vmatpush.msrb.mxu2 %v1149_v16  ;;  %v424_v14 = vld [vmem:[#allocation7 + $0x28] sm:$0xff] }
  0x3b   :  { %384 = vmatpush.msrb.mxu1 %v941_v4  ;;  %335 = vmatpush.msrb.mxu0 %v150_v34  ;;  %v1177_v4 = vsub.f32 %v430_v43, %v1154_v27  ;;  %v478_v21 = vand.u32 4294901760, %v1162_v33  ;;  %v484_v34 = vand.u32 4294901760, %v1165_v59  ;;  %v423_v43 = vld [vmem:[#allocation7 + $0x20] sm:$0xff]  ;;  %v1232_v20 = vand.u32 4294901760, %v424_v14 }
  0x3c   :  { %v497_v47 = vsub.f32 %v1173_v2, %v496_v30  ;;  %442 = vmatpush.msrb.mxu2 %v1152_v19 }
  0x3d   :  { %386 = vmatpush.msrb.mxu1 %v943_v5  ;;  %339 = vmatpush.msrb.mxu0 %v156_v41  ;;  %v479_v5 = vsub.f32 %v1162_v33, %v478_v21  ;;  %v485_v29 = vsub.f32 %v1165_v59, %v484_v34  ;;  %v1202_v41 = vsub.f32 %v428_v3, %v1170_v61 }
  0x3e   :  { %444 = vmatpush.msrb.mxu2 %v1154_v27 }
  0x3f   :  { %388 = vmatpush.msrb.mxu1 %v945_v9  ;;  %343 = vmatpush.msrb.mxu0 %v162_v50  ;;  %v502_v9 = vand.u32 4294901760, %v1177_v4  ;;  %v425_v50 = vld [vmem:[#allocation7 + $0x30] sm:$0xff]  ;;  %v480_v39 = vand.u32 4294901760, %v479_v5  ;;  %v486_v22 = vand.u32 4294901760, %v485_v29  ;;  %v498_v5 = vand.u32 4294901760, %v497_v47 }
  0x40   :  { %v509_v29 = vsub.f32 %v1190_v31, %v508_v24  ;;  %446 = vmatpush.msrb.mxu2 %v1156_v55 }
  0x41   :  { %390 = vmatpush.msrb.mxu1 %v947_v10  ;;  %347 = vmatpush.msrb.mxu0 %v168_v57  ;;  %v514_v10 = vand.u32 4294901760, %v1202_v41  ;;  %v1226_v57 = vand.u32 4294901760, %v425_v50  ;;  %v503_v3 = vsub.f32 %v1177_v4, %v502_v9 }
  0x42   :  { %481 = vmatpush.msrb.mxu3 %v480_v39  ;;  %v526_v39 = vand.u32 4294901760, %v1239_v52  ;;  %448 = vmatpush.msrb.mxu2 %v1170_v61 }
  0x43   :  { %392 = vmatpush.msrb.mxu1 %v949_v11  ;;  %351 = vmatpush.msrb.mxu0 %v174_v62  ;;  %v520_v11 = vand.u32 4294901760, %v1213_v44  ;;  %v422_v62 = vld [vmem:[#allocation7 + $0x18] sm:$0xff]  ;;  %v1246_v38 = vsub.f32 %v425_v50, %v1226_v57  ;;  %v515_v58 = vsub.f32 %v1202_v41, %v514_v10  ;;  %v504_v40 = vand.u32 4294901760, %v503_v3 }
  0x44   :  { %487 = vmatpush.msrb.mxu3 %v486_v22  ;;  %v1259_v50 = vsub.f32 %v424_v14, %v1232_v20  ;;  %v1261_v22 = vand.u32 4294901760, %v422_v62  ;;  %450 = vmatpush.msrb.mxu2 %v1185_v8 }
  0x45   :  { %394 = vmatpush.msrb.mxu1 %v961_v17  ;;  %355 = vmatpush.msrb.mxu0 %v180_v12  ;;  %v1248_v17 = vand.u32 4294901760, %v423_v43  ;;  %v421_v12 = vld [vmem:[#allocation7 + $0x10] sm:$0xff]  ;;  %v532_v47 = vand.u32 4294901760, %v1246_v38 }
  0x46   :  { %493 = vmatpush.msrb.mxu3 %v492_v53  ;;  %v1274_v53 = vand.u32 4294901760, %v421_v12  ;;  %v538_v3 = vand.u32 4294901760, %v1259_v50  ;;  %452 = vmatpush.msrb.mxu2 %v1224_v46 }
  0x47   :  { %396 = vmatpush.msrb.mxu1 %v977_v25  ;;  %359 = vmatpush.msrb.mxu0 %v186_v32  ;;  %v521_v25 = vsub.f32 %v1213_v44, %v520_v11  ;;  %v510_v32 = vand.u32 4294901760, %v509_v29  ;;  %v1272_v14 = vsub.f32 %v423_v43, %v1248_v17  ;;  %v1285_v43 = vsub.f32 %v422_v62, %v1261_v22 }
  0x48   :  { %499 = vmatpush.msrb.mxu3 %v498_v5  ;;  %v1287_v5 = vand.u32 4294901760, %v420_v0  ;;  %v533_v36 = vsub.f32 %v1246_v38, %v532_v47  ;;  %454 = vmatpush.msrb.mxu2 %v1226_v57  ;;  %v1298_v62 = vsub.f32 %v421_v12, %v1274_v53  ;;  %v1300_v29 = vand.u32 4294901760, %v419_v6 }
  0x49   :  { %398 = vmatpush.msrb.mxu1 %v981_v28  ;;  %363 = vmatpush.msrb.mxu0 %v192_v37  ;;  %v516_v28 = vand.u32 4294901760, %v515_v58  ;;  %v527_v37 = vsub.f32 %v1239_v52, %v526_v39  ;;  %v539_v42 = vsub.f32 %v1259_v50, %v538_v3 }
  0x4a   :  { %505 = vmatpush.msrb.mxu3 %v504_v40  ;;  %v1311_v58 = vsub.f32 %v420_v0, %v1287_v5  ;;  %456 = vmatpush.msrb.mxu2 %v1232_v20  ;;  %v1321_v12 = vsub.f32 %v419_v6, %v1300_v29 }
  0x4b   :  { %400 = vmatpush.msrb.mxu1 %v1000_v35  ;;  %367 = vmatpush.msrb.mxu0 %v198_v48  ;;  %v522_v35 = vand.u32 4294901760, %v521_v25  ;;  %v544_v48 = vand.u32 4294901760, %v1272_v14 }
  0x4c   :  { %511 = vmatpush.msrb.mxu3 %v510_v32  ;;  %v562_v25 = vand.u32 4294901760, %v1311_v58  ;;  %458 = vmatpush.msrb.mxu2 %v1248_v17  ;;  %v568_v32 = vand.u32 4294901760, %v1321_v12 }
  0x4d   :  { %402 = vmatpush.msrb.mxu1 %v1017_v45  ;;  %371 = vmatpush.msrb.mxu0 %v204_v56  ;;  %v528_v45 = vand.u32 4294901760, %v527_v37  ;;  %v550_v56 = vand.u32 4294901760, %v1285_v43  ;;  %v545_v49 = vsub.f32 %v1272_v14, %v544_v48 }
  0x4e   :  { %517 = vmatpush.msrb.mxu3 %v516_v28  ;;  %460 = vmatpush.msrb.mxu2 %v1261_v22  ;;  %v563_v28 = vsub.f32 %v1311_v58, %v562_v25 }
  0x4f   :  { %404 = vmatpush.msrb.mxu1 %v1029_v51  ;;  %375 = vmatpush.msrb.mxu0 %v210_v1  ;;  %v534_v51 = vand.u32 4294901760, %v533_v36  ;;  %v556_v1 = vand.u32 4294901760, %v1298_v62  ;;  %v551_v40 = vsub.f32 %v1285_v43, %v550_v56  ;;  %v546_v0 = vand.u32 4294901760, %v545_v49 }
  0x50   :  { %377 = vmatmul.f32.vlgmr.msrb.gmra.mxu0 %v1070_v18  ;;  %523 = vmatpush.msrb.mxu3 %v522_v35 }
  0x51   :  { %406 = vmatpush.msrb.mxu1 %v1037_v54  ;;  %579 = vmatpush.msra.mxu0 %v1162_v33  ;;  %v540_v54 = vand.u32 4294901760, %v539_v42 }
  0x52   :  { %529 = vmatpush.msrb.mxu3 %v528_v45  ;;  %462 = vmatpush.msrb.mxu2 %v1274_v53 }
  0x53   :  { %408 = vmatpush.msrb.mxu1 %v1053_v63  ;;  %582 = vmatpush.msra.mxu0 %v1165_v59  ;;  %v557_v63 = vsub.f32 %v1298_v62, %v556_v1 }
  0x54   :  { %535 = vmatpush.msrb.mxu3 %v534_v51  ;;  %464 = vmatpush.msrb.mxu2 %v1287_v5 }
  0x55   :  { %410 = vmatpush.msrb.mxu1 %v1068_v13  ;;  %585 = vmatpush.msra.mxu0 %v1168_v60  ;;  %v552_v13 = vand.u32 4294901760, %v551_v40  ;;  %v558_v6 = vand.u32 4294901760, %v557_v63 }
  0x56   :  { %541 = vmatpush.msrb.mxu3 %v540_v54  ;;  %466 = vmatpush.msrb.mxu2 %v1300_v29 }
  0x57   :  { %412 = vmatpush.msrb.mxu1 %v1072_v26  ;;  %588 = vmatpush.msra.mxu0 %v1173_v2  ;;  %v569_v26 = vsub.f32 %v1321_v12, %v568_v32 }
  0x58   :  { %414 = vmatmul.f32.vlgmr.msrb.gmra.mxu1 %v1070_v18  ;;  %547 = vmatpush.msrb.mxu3 %v546_v0  ;;  %v564_v18 = vand.u32 4294901760, %v563_v28 }
  0x59   :  { %632 = vmatpush.msra.mxu1 %v1145_v15  ;;  %591 = vmatpush.msra.mxu0 %v1177_v4  ;;  %v570_v37 = vand.u32 4294901760, %v569_v26 }
  0x5a   :  { %553 = vmatpush.msrb.mxu3 %v552_v13  ;;  %673 = vmatpush.msra.mxu2 %v478_v21 }
  0x5b   :  { %634 = vmatpush.msra.mxu1 %v1147_v23  ;;  %594 = vmatpush.msra.mxu0 %v1190_v31 }
  0x5c   :  { %559 = vmatpush.msrb.mxu3 %v558_v6  ;;  %677 = vmatpush.msra.mxu2 %v484_v34 }
  0x5d   :  { %636 = vmatpush.msra.mxu1 %v1149_v16  ;;  %597 = vmatpush.msra.mxu0 %v1202_v41 }
  0x5e   :  { %565 = vmatpush.msrb.mxu3 %v564_v18  ;;  %681 = vmatpush.msra.mxu2 %v490_v7 }
  0x5f   :  { %638 = vmatpush.msra.mxu1 %v1152_v19  ;;  %600 = vmatpush.msra.mxu0 %v1213_v44 }
  0x60   :  { %571 = vmatpush.msrb.mxu3 %v570_v37  ;;  %685 = vmatpush.msra.mxu2 %v496_v30 }
  0x61   :  { %640 = vmatpush.msra.mxu1 %v1154_v27  ;;  %603 = vmatpush.msra.mxu0 %v1239_v52 }
  0x62   :  { %740 = vmatpush.msra.mxu3 %v1145_v15  ;;  %689 = vmatpush.msra.mxu2 %v502_v9 }
  0x63   :  { %642 = vmatpush.msra.mxu1 %v1156_v55  ;;  %606 = vmatpush.msra.mxu0 %v1246_v38 }
  0x64   :  { %742 = vmatpush.msra.mxu3 %v1147_v23  ;;  %693 = vmatpush.msra.mxu2 %v508_v24 }
  0x65   :  { %644 = vmatpush.msra.mxu1 %v1170_v61  ;;  %609 = vmatpush.msra.mxu0 %v1259_v50 }
  0x66   :  { %744 = vmatpush.msra.mxu3 %v1149_v16  ;;  %697 = vmatpush.msra.mxu2 %v514_v10 }
  0x67   :  { %646 = vmatpush.msra.mxu1 %v1185_v8  ;;  %612 = vmatpush.msra.mxu0 %v1272_v14 }
  0x68   :  { %746 = vmatpush.msra.mxu3 %v1152_v19  ;;  %701 = vmatpush.msra.mxu2 %v520_v11 }
  0x69   :  { %648 = vmatpush.msra.mxu1 %v1224_v46  ;;  %615 = vmatpush.msra.mxu0 %v1285_v43 }
  0x6a   :  { %748 = vmatpush.msra.mxu3 %v1154_v27  ;;  %705 = vmatpush.msra.mxu2 %v526_v39 }
  0x6b   :  { %650 = vmatpush.msra.mxu1 %v1226_v57  ;;  %618 = vmatpush.msra.mxu0 %v1298_v62 }
  0x6c   :  { %750 = vmatpush.msra.mxu3 %v1156_v55  ;;  %709 = vmatpush.msra.mxu2 %v532_v47 }
  0x6d   :  { %652 = vmatpush.msra.mxu1 %v1232_v20  ;;  %621 = vmatpush.msra.mxu0 %v1311_v58 }
  0x6e   :  { %752 = vmatpush.msra.mxu3 %v1170_v61  ;;  %713 = vmatpush.msra.mxu2 %v538_v3 }
  0x6f   :  { %654 = vmatpush.msra.mxu1 %v1248_v17  ;;  %624 = vmatpush.msra.mxu0 %v1321_v12 }
  0x70   :  { %754 = vmatpush.msra.mxu3 %v1185_v8  ;;  %717 = vmatpush.msra.mxu2 %v544_v48 }
  0x71   :  { %656 = vmatpush.msra.mxu1 %v1261_v22 }
  0x72   :  { %756 = vmatpush.msra.mxu3 %v1224_v46  ;;  %721 = vmatpush.msra.mxu2 %v550_v56 }
  0x73   :  { %658 = vmatpush.msra.mxu1 %v1274_v53 }
  0x74   :  { %758 = vmatpush.msra.mxu3 %v1226_v57  ;;  %725 = vmatpush.msra.mxu2 %v556_v1 }
  0x75   :  { %660 = vmatpush.msra.mxu1 %v1287_v5 }
  0x76   :  { %760 = vmatpush.msra.mxu3 %v1232_v20  ;;  %729 = vmatpush.msra.mxu2 %v562_v25 }
  0x77   :  { %662 = vmatpush.msra.mxu1 %v1300_v29 }
  0x78   :  { %762 = vmatpush.msra.mxu3 %v1248_v17  ;;  %733 = vmatpush.msra.mxu2 %v568_v32 }
  0x7a   :  { %764 = vmatpush.msra.mxu3 %v1261_v22 }
  0x7c   :  { %766 = vmatpush.msra.mxu3 %v1274_v53 }
  0x7e   :  { %768 = vmatpush.msra.mxu3 %v1287_v5 }
  0x80   :  { %770 = vmatpush.msra.mxu3 %v1300_v29 }
  0xb1   :  { %v115_v23 = vpop.f32.mrf.mxu0 }
  0xb5   :  { %v216_v15 = vpop.f32.mrf.mxu1  ;;  %v309_v55 = vpop.f32.mrf.mxu3 }
  0xb6   :  { %v217_v16 = vadd.f32 %v216_v15, %v115_v23 }
  0xb7   :  { %v270_v19 = vpop.f32.mrf.mxu2 }
  0xb8   :  { %v271_v27 = vadd.f32 %v270_v19, %v217_v16 }
  0xba   :  { %v310_v33 = vadd.f32 %v309_v55, %v271_v27 }
  0xcd   :  { %v378_v59 = vpop.f32.mrf.mxu0 }
  0xce   :  { %v379_v60 = vadd.f32 %v378_v59, %v310_v33 }
  0xd5   :  { %v415_v61 = vpop.f32.mrf.mxu1 }
  0xd6   :  { %v416_v2 = vadd.f32 %v415_v61, %v379_v60 }
  0xd8   :  { %v418_v4 = vmax.f32 %v416_v2, 0.0 }
  0xda   :  { %v467_v21 = vand.u32 4294901760, %v418_v4 }
  0xdc   :  { %v468_v34 = vsub.f32 %v418_v4, %v467_v21  ;;  %573 = vmatmul.f32.vlgmr.msrb.gmra.mxu3 %v467_v21 }
  0xde   :  { %627 = vmatmul.f32.vlgmr.msra.gmra.mxu0 %v468_v34  ;;  %v469_v7 = vand.u32 4294901760, %v468_v34 }
  0xe0   :  { %666 = vmatmul.f32.vlgmr.msra.gmra.mxu1 %v469_v7  ;;  %v470_v8 = vsub.f32 %v468_v34, %v469_v7 }
  0xe2   :  { %v471_v30 = vand.u32 4294901760, %v470_v8 }
  0xe4   :  { %472 = vmatmul.f32.vlgmr.msrb.gmra.mxu2 %v471_v30  ;;  %772 = vmatmul.f32.vlgmr.msra.gmra.mxu3 %v467_v21 }
  0xec   :  { %735 = vmatmul.f32.vlgmr.msra.gmra.mxu2 %v467_v21 }
 0x15b   :  { %v628_v44 = vpop.f32.mrf.mxu0 }
 0x15d   :  { %v667_v10 = vpop.f32.mrf.mxu1 }
 0x15f   :  { %v574_v31 = vpop.f32.mrf.mxu3 }
 0x167   :  { %v473_v41 = vpop.f32.mrf.mxu2  ;;  %v773_v11 = vpop.f32.mrf.mxu3 }
 0x168   :  { %v575_v9 = vadd.f32 %v574_v31, %v473_v41 }
 0x16a   :  { %v629_v24 = vadd.f32 %v628_v44, %v575_v9 }
 0x16c   :  { %v668_v46 = vadd.f32 %v667_v10, %v629_v24 }
 0x16f   :  { %v736_v57 = vpop.f32.mrf.mxu2 }
 0x170   :  { %v737_v20 = vadd.f32 %v736_v57, %v668_v46 }
 0x172   :  { %v774_v52 = vadd.f32 %v773_v11, %v737_v20 }
 0x174   :  { %v776_v38 = vmax.f32 %v774_v52, 0.0 }
 0x176   :  { %777 = vst [vmem:[#allocation8] sm:$0xff] %v776_v38 }
 0x177   :  { %788 = dma.vmem_to_hbm [thread:$0]  %s784_s2, 128, %s786_s30, [#allocation4]  }
 0x178   :  { %902 = dma.done.wait [#allocation4], 128  }
 0x179   :  { %903 = vsyncadd [#allocation4], 4294967168 }
 0x17a   :  { %793 = vsyncpa [#allocation3], 1 }
 0x17b   :  { %794 = vsyncpa [#allocation6], 1 }
 0x17c   :  { %795 = vsyncpa [#allocation4], 1 }

</bundles_post_ra>
